<compile_context>
chip_gen: v7x
topology: tpu7x:2x2x1
jax: 0.10.0
libtpu: 0.0.40
codegen_flags: <defaults>
</compile_context>

<pallas_src>
import math

import jax
import jax.numpy as jnp
from jax.experimental import pallas as pl
from jax.experimental.pallas import tpu as pltpu

_LANE = 128


def _seg_add_kernel(x_ref, seg_ref, o_ref):
    # x_ref/o_ref: (T, L) tile of the flattened X; seg_ref: (P, L) segment
    # pattern (P == 1 in the lane-aligned paths).  Single VPU add per vreg.
    x = x_ref[...]
    seg = seg_ref[...]
    p = seg.shape[0]
    if p == 1:
        o_ref[...] = x + seg                       # (1, L) broadcast
    else:
        t, l = x.shape                             # t is a static multiple of p
        o_ref[...] = (x.reshape(t // p, p, l) + seg[None, :, :]).reshape(t, l)


def _round_up(x: int, m: int) -> int:
    return ((x + m - 1) // m) * m


def _tile_target_bytes() -> int:
    """Per-chip tile byte target for a pure streaming (DMA-bound) kernel.

    ~2 MiB already reaches ~85% of HBM roofline on v5e/v6e; v7x's ~3.2 TB/s
    HBM needs larger tiles to hide the ~0.35 us/step fixed cost, and its
    64 MiB per-TC VMEM still holds 4 x 8 MiB double-buffered slabs.
    """
    try:
        vmem = getattr(pltpu.get_tpu_info(), "vmem_capacity_bytes", None)
    except Exception:
        vmem = None
    if vmem is not None and vmem <= (64 << 20):    # v7x-class part
        return 8 << 20
    return 4 << 20                                  # v5e / v6e


def _pick_row_tile(rows: int, row_bytes: int, unit: int, target_bytes: int) -> int:
    """Row tile: multiple of `unit`, near `target_bytes`, >= 2 grid steps when
    the input is large enough (so both v7x TensorCores draw HBM)."""
    t = max(unit, (target_bytes // max(row_bytes * unit, 1)) * unit)
    if rows > 2 * unit:
        # Cap at ~half the rows (rounded up to `unit`) -> grid of >= 2 steps.
        t = min(t, _round_up((rows + 1) // 2, unit))
    if t >= rows:
        t = rows  # single full-extent block (always a legal block shape)
    return t


def segment_embeddings(x, seg_emb, first_sentence: bool):
    """Pallas equivalent of SegmentEmbeddings.forward (dropout p=0 is identity).

    x:       (B, S, H)
    seg_emb: (2, 1, H) parameter
    first_sentence: Python bool -> selects row 0 or 1 (resolved in the wrapper,
    so only the needed row is passed to the kernel and there is no in-kernel
    select or scalar prefetch).
    """
    B, S, H = x.shape
    dtype = x.dtype
    itemsize = jnp.dtype(dtype).itemsize
    # dtype-aware sublane alignment: 8 rows f32, 16 bf16/f16, 32 int8/fp8.
    sub = max(8, 8 * (4 // itemsize))

    seg_row = seg_emb[0 if first_sentence else 1].reshape(H)   # (H,)
    total = B * S * H

    if H % _LANE == 0:
        # Path A: already lane-dense; flatten batch+seq into one row axis.
        lanes, P = H, 1
        rows = B * S
        x_arr = x.reshape(rows, lanes)
        seg_arr = seg_row.reshape(1, lanes)
    else:
        lcm = H * _LANE // math.gcd(H, _LANE)
        if total % lcm == 0:
            # Path B: fold everything onto a 128-wide lane axis.  The segment
            # pattern repeats every P = lcm(H,128)/128 rows, so the kernel adds
            # a (P,128) pattern block -> stores remain unmasked full-lane vst.
            lanes = _LANE
            P = lcm // _LANE
            rows = total // _LANE
            x_arr = x.reshape(rows, lanes)
            seg_arr = jnp.tile(seg_row, lcm // H).reshape(P, lanes)
        else:
            # Path C (rare, degenerate shapes): sub-128 lane stores; correct
            # but slower.  TODO(synk): zero-pad H to a multiple of 128 to keep
            # stores lane-dense when this path matters.
            lanes, P = H, 1
            rows = B * S
            x_arr = x.reshape(rows, lanes)
            seg_arr = seg_row.reshape(1, lanes)

    row_bytes = lanes * itemsize
    unit = sub * P // math.gcd(sub, P)   # block rows must be a multiple of both
    t_rows = _pick_row_tile(rows, row_bytes, unit, _tile_target_bytes())
    grid = (pl.cdiv(rows, t_rows),)

    tile_bytes = t_rows * lanes * itemsize
    seg_bytes = P * lanes * itemsize
    # 2x double-buffered input + 2x double-buffered output + seg + headroom.
    vmem_limit = max(4 * tile_bytes + 2 * seg_bytes + (4 << 20), 16 << 20)

    out = pl.pallas_call(
        _seg_add_kernel,
        out_shape=jax.ShapeDtypeStruct((rows, lanes), dtype),
        grid=grid,
        in_specs=[
            pl.BlockSpec((t_rows, lanes), lambda i: (i, 0)),   # X tile
            pl.BlockSpec((P, lanes), lambda i: (0, 0)),        # seg pattern (resident)
        ],
        out_specs=pl.BlockSpec((t_rows, lanes), lambda i: (i, 0)),
        input_output_aliases={0: 0},   # in-place "X +="; donate x at the call site
        cost_estimate=pl.CostEstimate(
            flops=total,
            transcendentals=0,
            bytes_accessed=2 * total * itemsize + seg_bytes,
        ),
        compiler_params=pltpu.CompilerParams(
            dimension_semantics=("parallel",),       # v7x: split grid across 2 TCs
            vmem_limit_bytes=int(vmem_limit),
        ),
    )(x_arr, seg_arr)

    # TODO(synk): dropout with p > 0 would need pltpu.prng_seed/prng_random_bits
    # seeded per grid step; the module default p = 0 is an identity.
    return out.reshape(B, S, H)


if __name__ == "__main__":
    B, S, H = 2, 8, 32  # batch, seq, num_hiddens

    key = jax.random.PRNGKey(0)
    kx, kw = jax.random.split(key)
    x = jax.random.normal(kx, (B, S, H), dtype=jnp.float32)
    # Mirrors nn.Parameter(torch.randn((2, 1, num_hiddens)))
    seg_emb = jax.random.normal(kw, (2, 1, H), dtype=jnp.float32)

    out_first = segment_embeddings(x, seg_emb, first_sentence=True)
    out_second = segment_embeddings(x, seg_emb, first_sentence=False)
    jax.block_until_ready((out_first, out_second))

    # Reference check (pure JAX)
    ref_first = x + seg_emb[0].reshape(1, H)
    ref_second = x + seg_emb[1].reshape(1, H)
    assert jnp.allclose(out_first, ref_first, atol=1e-6)
    assert jnp.allclose(out_second, ref_second, atol=1e-6)

    print("KERNEL_OK")
</pallas_src>

<mosaic_0001>
module attributes {stable_mosaic.version = 11 : i64} {
  func.func @_seg_add_kernel(%arg0: i32, %arg1: memref<4x128xf32, #tpu.memory_space<vmem>>, %arg2: memref<1x128xf32, #tpu.memory_space<vmem>>, %arg3: memref<4x128xf32, #tpu.memory_space<vmem>>) attributes {dimension_semantics = [#tpu.dimension_semantics<parallel>], iteration_bounds = array<i64: 1>, scalar_prefetch = 0 : i64, scratch_operands = 0 : i64, tpu.core_type = #tpu.core_type<tc>, window_params = [{transform_indices = @transform_0, window_bounds = array<i64: 4, 128>}, {pipeline_mode = #tpu.pipeline_mode<synchronous>, transform_indices = @transform_1, window_bounds = array<i64: 1, 128>}, {transform_indices = @transform_2, window_bounds = array<i64: 4, 128>}]} {
    %c0 = arith.constant 0 : index
    %c0_0 = arith.constant 0 : index
    %0 = vector.load %arg1[%c0, %c0_0] : memref<4x128xf32, #tpu.memory_space<vmem>>, vector<4x128xf32>
    %c0_1 = arith.constant 0 : index
    %c0_2 = arith.constant 0 : index
    %1 = vector.load %arg2[%c0_1, %c0_2] : memref<1x128xf32, #tpu.memory_space<vmem>>, vector<1x128xf32>
    %2 = vector.broadcast %1 : vector<1x128xf32> to vector<4x128xf32>
    %3 = arith.addf %0, %2 : vector<4x128xf32>
    %c0_3 = arith.constant 0 : index
    %c0_4 = arith.constant 0 : index
    %4 = vector.load %arg3[%c0_3, %c0_4] : memref<4x128xf32, #tpu.memory_space<vmem>>, vector<4x128xf32>
    tpu.vector_store %arg3[%c0_3, %c0_4], %3 {strides = array<i32>} : memref<4x128xf32, #tpu.memory_space<vmem>>, vector<4x128xf32>,
    return
  }
  func.func @transform_0(%arg0: i32) -> (i32, i32) {
    %c0_i32 = arith.constant 0 : i32
    %c0_i32_0 = arith.constant 0 : i32
    return %arg0, %c0_i32 : i32, i32
  }
  func.func @transform_1(%arg0: i32) -> (i32, i32) {
    %c0_i32 = arith.constant 0 : i32
    %c0_i32_0 = arith.constant 0 : i32
    %c0_i32_1 = arith.constant 0 : i32
    return %c0_i32, %c0_i32_0 : i32, i32
  }
  func.func @transform_2(%arg0: i32) -> (i32, i32) {
    %c0_i32 = arith.constant 0 : i32
    %c0_i32_0 = arith.constant 0 : i32
    return %arg0, %c0_i32 : i32, i32
  }
}

</mosaic_0001>

<bundles_post_ra>
// kernel: tpu_custom_call.1
= control target key start
LH: loop header
LB: loop body
LE: loop exit
PB: predicated region body
PF: predicated region fallthrough
CT: control target
= control target key end

     0   :  { %7 = vsyncpa [#allocation3], 0  ;;  %s144_s0 = inlined_call_operand.hbm [shape: f32[4,128], index: 0, kind: input, shape index: {}, may-alias: {0,2}]   ;;  %s145_s1 = inlined_call_operand.vmem [shape: f32[1,128], index: 1, kind: input, shape index: {}]   ;;  %s146_s2 = inlined_call_operand.hbm [shape: f32[4,128], index: 2, kind: output, shape index: {}, may-alias: {0,2}]  }
   0x1   :  { %8 = vsyncpa [#allocation4], 0  ;;  %s100_s9 = smov [#allocation2]   ;;  %s52_s13 = scalar_lea.hbm %s144_s0, 64 }
   0x2   :  { %s15_s10 = sshll.u32 %s100_s9, 4  ;;  %p53_p0 = scmp.ne.s32.totalorder %s144_s0, %s52_s13  ;;  %s16_s10 = int_to_ptr.vmem [resolvable:$true] %s15_s10 }
   0x3   :  { %p56_p1 = scmp.lt.u32.totalorder %s52_s13, %s144_s0 }
   0x5   :  { %p58_p2 = pnand %p56_p1, %p53_p0 }
   0x7   :  { %61 = shalt.err (!%p58_p2)
}
   0x8   :  { %s62_s18 = scalar_lea.vmem %s16_s10, 64  ;;  %p67_p4 = scmp.lt.s32.totalorder %s16_s10, %s16_s10 }
   0x9   :  { %p63_p3 = scmp.ne.s32.totalorder %s16_s10, %s62_s18  ;;  %p68_p5 = scmp.lt.s32.totalorder %s62_s18, %s62_s18 }
   0xb   :  { %p69_p6 = por %p68_p5, %p67_p4 }
   0xd   :  { %p70_p7 = pnand %p69_p6, %p63_p3 }
   0xf   :  { %73 = shalt.err (!%p70_p7)
}
  0x10   :  { %18 = dma.hbm_to_vmem [thread:$0]  %s144_s0, 64, %s16_s10, [#allocation3]  }
  0x11   :  { %96 = dma.done.wait [#allocation3], 64  }
  0x12   :  { %97 = vsyncadd [#allocation3], 4294967232  ;;  %s101_s21 = smov [#allocation5]   ;;  %v24_v0 = vld [vmem:[#allocation2] sm:$0xf] }
  0x13   :  { %s40_s22 = sshll.u32 %s101_s21, 4  ;;  %v49_v1 = vld [vmem:[%s145_s1] ss:$0 sm:$0xff]  ;;  %s41_s22 = int_to_ptr.vmem [resolvable:$true] %s40_s22 }
  0x14   :  { %v32_v2 = vadd.f32 %v49_v1, %v24_v0  ;;  %s74_s25 = scalar_lea.vmem %s41_s22, 64  ;;  %p79_p9 = scmp.lt.s32.totalorder %s41_s22, %s41_s22 }
  0x15   :  { %p75_p8 = scmp.ne.s32.totalorder %s41_s22, %s74_s25  ;;  %p80_p10 = scmp.lt.s32.totalorder %s74_s25, %s74_s25 }
  0x16   :  { %33 = vst [vmem:[#allocation5] sm:$0xf] %v32_v2 }
  0x17   :  { %p81_p11 = por %p80_p10, %p79_p9 }
  0x19   :  { %p82_p12 = pnand %p81_p11, %p75_p8 }
  0x1b   :  { %85 = shalt.err (!%p82_p12)
}
  0x1c   :  { %s86_s27 = scalar_lea.hbm %s146_s2, 64 }
  0x1d   :  { %p87_p13 = scmp.ne.s32.totalorder %s146_s2, %s86_s27  ;;  %p90_p0 = scmp.lt.u32.totalorder %s86_s27, %s146_s2 }
  0x1f   :  { %p92_p1 = pnand %p90_p0, %p87_p13 }
  0x21   :  { %95 = shalt.err (!%p92_p1)
}
  0x22   :  { %43 = dma.vmem_to_hbm [thread:$0]  %s41_s22, 64, %s146_s2, [#allocation4]  }
  0x23   :  { %98 = dma.done.wait [#allocation4], 64  }
  0x24   :  { %99 = vsyncadd [#allocation4], 4294967232 }
  0x25   :  { %47 = vsyncpa [#allocation3], 1 }
  0x26   :  { %48 = vsyncpa [#allocation4], 1 }

</bundles_post_ra>
